<compile_context>
chip_gen: v6e
topology: v6e:2x2x1
jax: 0.10.0
libtpu: 0.0.40
codegen_flags: <defaults>
</compile_context>

<pallas_src>
import functools

import jax
import jax.numpy as jnp
from jax.experimental import pallas as pl
from jax.experimental.pallas import tpu as pltpu

EPS = 1e-5      # nn.BatchNorm2d default
LANE = 128


def _round_up(v, m):
    return (v + m - 1) // m * m


def fused_conv_bn_relu(x_nhwc, w_hwio, gamma, beta, *, block_rows=None):
    """Conv(kh x kw, stride 1, VALID) + batch-stat BN + ReLU.  Returns NHWC."""
    N, H, W, Cin = x_nhwc.shape
    kh, kw, _, Cout = w_hwio.shape
    OH, OW = H - kh + 1, W - kw + 1
    assert OH > 0 and OW > 0
    K = kh * kw * Cin                      # patch length (27 for the stem)

    # Lane packing: PF output positions share one 128-lane row (PF*Cout == 128
    # for the stem's Cout=32) -> stored tensors have zero dead lanes.
    if Cout % LANE == 0:
        PF = 1
    else:
        assert LANE % Cout == 0, f"Cout={Cout} must divide or be divisible by {LANE}"
        PF = LANE // Cout
    Cpack = PF * Cout
    PFK = PF * K

    P = OH * OW                            # positions per image
    P4 = -(-P // PF)                       # packed rows per image
    if block_rows is None:
        # ~1K packed rows = ~4K output positions per tile; a few hundred KB per
        # double-buffered stream.  Raise on v5e/v6e (128 MiB VMEM), keep modest
        # on v7x (64 MiB).
        block_rows = 1024
    TM4 = _round_up(min(block_rows, P4), 32)
    n_t = -(-P4 // TM4)
    P4_pad = n_t * TM4
    M_true = N * P                         # BN population size

    # ------- wrapper-side im2col + position packing (one fused XLA producer) -------
    x = x_nhwc.astype(jnp.float32)
    patches = [x[:, di:di + OH, dj:dj + OW, :]
               for di in range(kh) for dj in range(kw)]
    xp = jnp.concatenate(patches, axis=-1).reshape(N, P, K)          # (N, P, K)
    xp = jnp.pad(xp, ((0, 0), (0, PF * P4_pad - P), (0, 0)))         # zero tail
    xp = xp.reshape(N, P4_pad, PFK).astype(jnp.bfloat16)             # PF positions / row

    w2 = w_hwio.astype(jnp.float32).reshape(K, Cout)
    # Block-diagonal weight: lane group g of the output = position PF*row + g.
    w_bd = jnp.kron(jnp.eye(PF, dtype=jnp.float32), w2).astype(jnp.bfloat16)  # (PFK, Cpack)

    # ------- pass 1: conv (single MXU dot) + per-batch channel sum / sumsq -------
    def pass1_kernel(xp_ref, w_ref, y_ref, stats_ref):
        @pl.when(pl.program_id(1) == 0)
        def _():
            stats_ref[...] = jnp.zeros_like(stats_ref)

        acc = jnp.dot(xp_ref[...], w_ref[...],
                      preferred_element_type=jnp.float32)            # (TM4, Cpack) f32
        y_ref[...] = acc.astype(y_ref.dtype)                         # lane-dense bf16 store
        # Padded tail rows are exact zeros -> contribute nothing; no mask needed.
        stats_ref[0:1, :] += jnp.sum(acc, axis=0, keepdims=True)
        stats_ref[1:2, :] += jnp.sum(acc * acc, axis=0, keepdims=True)
        # TODO(synk): E[x^2]-E[x]^2 in f32 can lose precision at very large
        # N*OH*OW; switch to a shifted / compensated accumulation if needed.

    xp_spec = pl.BlockSpec((None, TM4, PFK), lambda n, t: (n, t, 0))
    w_spec = pl.BlockSpec((PFK, Cpack), lambda n, t: (0, 0))
    y_spec = pl.BlockSpec((None, TM4, Cpack), lambda n, t: (n, t, 0))
    stats_spec = pl.BlockSpec((None, 2, Cpack), lambda n, t: (n, 0, 0))

    flops1 = 2 * N * P4_pad * PFK * Cpack + 3 * N * P4_pad * Cpack
    bytes1 = (xp.size * 2 + w_bd.size * 2
              + N * P4_pad * Cpack * 2 + N * 2 * Cpack * 4)

    y_pack, stats = pl.pallas_call(
        pass1_kernel,
        grid=(N, n_t),
        in_specs=[xp_spec, w_spec],
        out_specs=[y_spec, stats_spec],
        out_shape=[
            jax.ShapeDtypeStruct((N, P4_pad, Cpack), jnp.bfloat16),
            jax.ShapeDtypeStruct((N, 2, Cpack), jnp.float32),
        ],
        compiler_params=pltpu.CompilerParams(
            dimension_semantics=("parallel", "arbitrary"),   # per-batch stats carry over t only
            vmem_limit_bytes=32 * 1024 * 1024),
        cost_estimate=pl.CostEstimate(flops=flops1, transcendentals=0,
                                      bytes_accessed=bytes1),
    )(xp, w_bd)

    # ------- fold BN (batch stats) + gamma/beta into one scale/shift (tiny, XLA) -------
    s = stats.sum(axis=0)                               # (2, Cpack): sum batch partials
    ch_sum = s[0].reshape(PF, Cout).sum(axis=0)         # fold the PF lane groups
    ch_sq = s[1].reshape(PF, Cout).sum(axis=0)
    mean = ch_sum / M_true
    var = jnp.maximum(ch_sq / M_true - mean * mean, 0.0)
    inv_std = jax.lax.rsqrt(var + EPS)
    scale = gamma.astype(jnp.float32) * inv_std
    shift = beta.astype(jnp.float32) - mean * scale
    scale_p = jnp.tile(scale, PF).reshape(1, Cpack)
    shift_p = jnp.tile(shift, PF).reshape(1, Cpack)

    # ------- pass 2: scale * y + shift, ReLU (packed, lane-dense) -------
    # TODO(synk): when composing into the full network, fuse this pass into the
    # consumer kernel's input pipeline instead of a standalone HBM round trip.
    def pass2_kernel(y_ref, scale_ref, shift_ref, o_ref):
        y = y_ref[...].astype(jnp.float32)
        o_ref[...] = jnp.maximum(y * scale_ref[...] + shift_ref[...], 0.0)

    vec_spec = pl.BlockSpec((1, Cpack), lambda n, t: (0, 0))
    out_pack = pl.pallas_call(
        pass2_kernel,
        grid=(N, n_t),
        in_specs=[y_spec, vec_spec, vec_spec],
        out_specs=y_spec,
        out_shape=jax.ShapeDtypeStruct((N, P4_pad, Cpack), jnp.float32),
        compiler_params=pltpu.CompilerParams(
            dimension_semantics=("parallel", "parallel"),   # megacore-friendly
            vmem_limit_bytes=32 * 1024 * 1024),
        cost_estimate=pl.CostEstimate(flops=3 * N * P4_pad * Cpack,
                                      transcendentals=0,
                                      bytes_accessed=N * P4_pad * Cpack * 6),
    )(y_pack, scale_p, shift_p)

    # Unpack: (N, P4_pad, PF*Cout) -> (N, OH, OW, Cout).  Single fused XLA copy.
    out = out_pack.reshape(N, P4_pad * PF, Cout)[:, :P, :].reshape(N, OH, OW, Cout)
    return out


@functools.partial(jax.jit, static_argnames=("block_rows",))
def efficientnet_b0_q_forward(x_nchw, w_hwio, gamma, beta, block_rows=None):
    """Mirrors Efficientnet_b0_Q.forward: BGR->RGB channel reverse +
    (x - 127.5) / 127.5, then the first fused Conv+BN+activation block."""
    bias = 255.0 / 2.0
    x = (x_nchw[:, ::-1, :, :] - bias) / bias
    x_nhwc = jnp.transpose(x, (0, 2, 3, 1))
    y = fused_conv_bn_relu(x_nhwc, w_hwio, gamma, beta, block_rows=block_rows)
    # NHWC -> NCHW only to match the PyTorch contract; keep NHWC when composing.
    return jnp.transpose(y, (0, 3, 1, 2))


def reference_forward(x_nchw, w_hwio, gamma, beta):
    """Pure-JAX f32 reference (lax.conv + batch-stat BN + ReLU)."""
    bias = 255.0 / 2.0
    x = (x_nchw[:, ::-1, :, :] - bias) / bias
    x = jnp.transpose(x, (0, 2, 3, 1))
    y = jax.lax.conv_general_dilated(
        x, w_hwio, window_strides=(1, 1), padding="VALID",
        dimension_numbers=("NHWC", "HWIO", "NHWC"))
    mean = jnp.mean(y, axis=(0, 1, 2), keepdims=True)
    var = jnp.mean((y - mean) ** 2, axis=(0, 1, 2), keepdims=True)
    y = (y - mean) * jax.lax.rsqrt(var + EPS)
    y = y * gamma.reshape(1, 1, 1, -1) + beta.reshape(1, 1, 1, -1)
    y = jnp.maximum(y, 0.0)
    return jnp.transpose(y, (0, 3, 1, 2))


if __name__ == "__main__":
    key = jax.random.PRNGKey(0)
    k1, k2, k3, k4 = jax.random.split(key, 4)

    # Module implies 3-channel 0..255 images; small stem-like conv 3 -> 32.
    N, Cin, H, W = 2, 3, 16, 16
    Cout, KH, KW = 32, 3, 3

    x = jax.random.uniform(k1, (N, Cin, H, W), dtype=jnp.float32,
                           minval=0.0, maxval=255.0)
    w = jax.random.normal(k2, (KH, KW, Cin, Cout), dtype=jnp.float32) * 0.1
    gamma = 1.0 + 0.1 * jax.random.normal(k3, (Cout,), dtype=jnp.float32)
    beta = 0.1 * jax.random.normal(k4, (Cout,), dtype=jnp.float32)

    # block_rows=32 (packed rows) forces 2 tiles per image so the cross-tile
    # BN-stat accumulation and the padded-tail path are exercised even at this
    # toy size.
    out = efficientnet_b0_q_forward(x, w, gamma, beta, block_rows=32)
    out = jax.block_until_ready(out)

    ref = jax.block_until_ready(reference_forward(x, w, gamma, beta))
    assert out.shape == (N, Cout, H - KH + 1, W - KW + 1), out.shape
    # bf16 matmul operands + bf16 intermediate -> looser tolerance than pure f32
    err = float(jnp.max(jnp.abs(out - ref)))
    assert jnp.allclose(out, ref, atol=6e-2, rtol=6e-2), err
    print("KERNEL_OK")
</pallas_src>

<mosaic_0001>
module attributes {stable_mosaic.version = 11 : i64} {
  func.func @pass1_kernel(%arg0: i32, %arg1: i32, %arg2: memref<1x32x108xbf16, #tpu.memory_space<vmem>>, %arg3: memref<108x128xbf16, #tpu.memory_space<vmem>>, %arg4: memref<1x32x128xbf16, #tpu.memory_space<vmem>>, %arg5: memref<1x2x128xf32, #tpu.memory_space<vmem>>) attributes {dimension_semantics = [#tpu.dimension_semantics<parallel>, #tpu.dimension_semantics<arbitrary>], iteration_bounds = array<i64: 2, 2>, scalar_prefetch = 0 : i64, scratch_operands = 0 : i64, tpu.core_type = #tpu.core_type<tc>, window_params = [{transform_indices = @transform_0, window_bounds = array<i64: 1, 32, 108>}, {pipeline_mode = #tpu.pipeline_mode<synchronous>, transform_indices = @transform_1, window_bounds = array<i64: 108, 128>}, {transform_indices = @transform_2, window_bounds = array<i64: 1, 32, 128>}, {transform_indices = @transform_3, window_bounds = array<i64: 1, 2, 128>}]} {
    %c0_i32 = arith.constant 0 : i32
    %0 = arith.cmpi eq, %arg1, %c0_i32 : i32
    %1 = arith.extui %0 : i1 to i32
    %c0_i32_0 = arith.constant 0 : i32
    %2 = arith.cmpi ne, %1, %c0_i32_0 : i32
    scf.if %2 {
      %cst_21 = arith.constant 0.000000e+00 : f32
      %28 = vector.broadcast %cst_21 : f32 to vector<2x128xf32>
      %c0_22 = arith.constant 0 : index
      %c0_23 = arith.constant 0 : index
      %c0_24 = arith.constant 0 : index
      %29 = vector.load %arg5[%c0_22, %c0_23, %c0_24] : memref<1x2x128xf32, #tpu.memory_space<vmem>>, vector<1x2x128xf32>
      %30 = vector.shape_cast %29 : vector<1x2x128xf32> to vector<2x128xf32>
      %31 = vector.shape_cast %28 : vector<2x128xf32> to vector<1x2x128xf32>
      tpu.vector_store %arg5[%c0_22, %c0_23, %c0_24], %31 {strides = array<i32>} : memref<1x2x128xf32, #tpu.memory_space<vmem>>, vector<1x2x128xf32>,
    } else {
    }
    %c0 = arith.constant 0 : index
    %c0_1 = arith.constant 0 : index
    %c0_2 = arith.constant 0 : index
    %3 = vector.load %arg2[%c0, %c0_1, %c0_2] : memref<1x32x108xbf16, #tpu.memory_space<vmem>>, vector<1x32x108xbf16>
    %4 = vector.shape_cast %3 : vector<1x32x108xbf16> to vector<32x108xbf16>
    %c0_3 = arith.constant 0 : index
    %c0_4 = arith.constant 0 : index
    %5 = vector.load %arg3[%c0_3, %c0_4] : memref<108x128xbf16, #tpu.memory_space<vmem>>, vector<108x128xbf16>
    %cst = arith.constant dense<0.000000e+00> : vector<32x128xf32>
    %6 = tpu.matmul %4, %5, %cst {dimension_numbers = #tpu.dot_dimension_numbers<[1], [0], [0], [1], [0, 0, 1, 1], [], []>} : vector<32x108xbf16>, vector<108x128xbf16>, vector<32x128xf32> -> vector<32x128xf32>
    %7 = arith.truncf %6 : vector<32x128xf32> to vector<32x128xbf16>
    %c0_5 = arith.constant 0 : index
    %c0_6 = arith.constant 0 : index
    %c0_7 = arith.constant 0 : index
    %8 = vector.load %arg4[%c0_5, %c0_6, %c0_7] : memref<1x32x128xbf16, #tpu.memory_space<vmem>>, vector<1x32x128xbf16>
    %9 = vector.shape_cast %8 : vector<1x32x128xbf16> to vector<32x128xbf16>
    %10 = vector.shape_cast %7 : vector<32x128xbf16> to vector<1x32x128xbf16>
    tpu.vector_store %arg4[%c0_5, %c0_6, %c0_7], %10 {strides = array<i32>} : memref<1x32x128xbf16, #tpu.memory_space<vmem>>, vector<1x32x128xbf16>,
    %c0_8 = arith.constant 0 : index
    %c0_9 = arith.constant 0 : index
    %c0_10 = arith.constant 0 : index
    %11 = vector.load %arg5[%c0_8, %c0_9, %c0_10] : memref<1x2x128xf32, #tpu.memory_space<vmem>>, vector<1x1x128xf32>
    %12 = vector.shape_cast %11 : vector<1x1x128xf32> to vector<1x128xf32>
    %cst_11 = arith.constant dense<0.000000e+00> : vector<128xf32>
    %13 = vector.multi_reduction <add>, %6, %cst_11 [0] : vector<32x128xf32> to vector<128xf32>
    %14 = vector.shape_cast %13 : vector<128xf32> to vector<1x128xf32>
    %15 = arith.addf %12, %14 : vector<1x128xf32>
    %c0_12 = arith.constant 0 : index
    %c0_13 = arith.constant 0 : index
    %c0_14 = arith.constant 0 : index
    %16 = vector.load %arg5[%c0_12, %c0_13, %c0_14] : memref<1x2x128xf32, #tpu.memory_space<vmem>>, vector<1x1x128xf32>
    %17 = vector.shape_cast %16 : vector<1x1x128xf32> to vector<1x128xf32>
    %18 = vector.shape_cast %15 : vector<1x128xf32> to vector<1x1x128xf32>
    tpu.vector_store %arg5[%c0_12, %c0_13, %c0_14], %18 {strides = array<i32>} : memref<1x2x128xf32, #tpu.memory_space<vmem>>, vector<1x1x128xf32>,
    %c0_15 = arith.constant 0 : index
    %c1 = arith.constant 1 : index
    %c0_16 = arith.constant 0 : index
    %19 = vector.load %arg5[%c0_15, %c1, %c0_16] : memref<1x2x128xf32, #tpu.memory_space<vmem>>, vector<1x1x128xf32>
    %20 = vector.shape_cast %19 : vector<1x1x128xf32> to vector<1x128xf32>
    %21 = arith.mulf %6, %6 : vector<32x128xf32>
    %cst_17 = arith.constant dense<0.000000e+00> : vector<128xf32>
    %22 = vector.multi_reduction <add>, %21, %cst_17 [0] : vector<32x128xf32> to vector<128xf32>
    %23 = vector.shape_cast %22 : vector<128xf32> to vector<1x128xf32>
    %24 = arith.addf %20, %23 : vector<1x128xf32>
    %c0_18 = arith.constant 0 : index
    %c1_19 = arith.constant 1 : index
    %c0_20 = arith.constant 0 : index
    %25 = vector.load %arg5[%c0_18, %c1_19, %c0_20] : memref<1x2x128xf32, #tpu.memory_space<vmem>>, vector<1x1x128xf32>
    %26 = vector.shape_cast %25 : vector<1x1x128xf32> to vector<1x128xf32>
    %27 = vector.shape_cast %24 : vector<1x128xf32> to vector<1x1x128xf32>
    tpu.vector_store %arg5[%c0_18, %c1_19, %c0_20], %27 {strides = array<i32>} : memref<1x2x128xf32, #tpu.memory_space<vmem>>, vector<1x1x128xf32>,
    return
  }
  func.func @transform_0(%arg0: i32, %arg1: i32) -> (i32, i32, i32) {
    %c0_i32 = arith.constant 0 : i32
    %c0_i32_0 = arith.constant 0 : i32
    return %arg0, %arg1, %c0_i32 : i32, i32, i32
  }
  func.func @transform_1(%arg0: i32, %arg1: i32) -> (i32, i32) {
    %c0_i32 = arith.constant 0 : i32
    %c0_i32_0 = arith.constant 0 : i32
    %c0_i32_1 = arith.constant 0 : i32
    return %c0_i32, %c0_i32_0 : i32, i32
  }
  func.func @transform_2(%arg0: i32, %arg1: i32) -> (i32, i32, i32) {
    %c0_i32 = arith.constant 0 : i32
    %c0_i32_0 = arith.constant 0 : i32
    return %arg0, %arg1, %c0_i32 : i32, i32, i32
  }
  func.func @transform_3(%arg0: i32, %arg1: i32) -> (i32, i32, i32) {
    %c0_i32 = arith.constant 0 : i32
    %c0_i32_0 = arith.constant 0 : i32
    %c0_i32_1 = arith.constant 0 : i32
    return %arg0, %c0_i32, %c0_i32_0 : i32, i32, i32
  }
}

module attributes {stable_mosaic.version = 11 : i64} {
  func.func @pass2_kernel(%arg0: i32, %arg1: i32, %arg2: memref<1x32x128xbf16, #tpu.memory_space<vmem>>, %arg3: memref<1x128xf32, #tpu.memory_space<vmem>>, %arg4: memref<1x128xf32, #tpu.memory_space<vmem>>, %arg5: memref<1x32x128xf32, #tpu.memory_space<vmem>>) attributes {dimension_semantics = [#tpu.dimension_semantics<parallel>, #tpu.dimension_semantics<parallel>], iteration_bounds = array<i64: 2, 2>, scalar_prefetch = 0 : i64, scratch_operands = 0 : i64, tpu.core_type = #tpu.core_type<tc>, window_params = [{transform_indices = @transform_0, window_bounds = array<i64: 1, 32, 128>}, {pipeline_mode = #tpu.pipeline_mode<synchronous>, transform_indices = @transform_1, window_bounds = array<i64: 1, 128>}, {pipeline_mode = #tpu.pipeline_mode<synchronous>, transform_indices = @transform_2, window_bounds = array<i64: 1, 128>}, {transform_indices = @transform_3, window_bounds = array<i64: 1, 32, 128>}]} {
    %c0 = arith.constant 0 : index
    %c0_0 = arith.constant 0 : index
    %c0_1 = arith.constant 0 : index
    %0 = vector.load %arg2[%c0, %c0_0, %c0_1] : memref<1x32x128xbf16, #tpu.memory_space<vmem>>, vector<1x32x128xbf16>
    %1 = vector.shape_cast %0 : vector<1x32x128xbf16> to vector<32x128xbf16>
    %2 = arith.extf %1 : vector<32x128xbf16> to vector<32x128xf32>
    %c0_2 = arith.constant 0 : index
    %c0_3 = arith.constant 0 : index
    %3 = vector.load %arg3[%c0_2, %c0_3] : memref<1x128xf32, #tpu.memory_space<vmem>>, vector<1x128xf32>
    %4 = vector.broadcast %3 : vector<1x128xf32> to vector<32x128xf32>
    %5 = arith.mulf %2, %4 : vector<32x128xf32>
    %c0_4 = arith.constant 0 : index
    %c0_5 = arith.constant 0 : index
    %6 = vector.load %arg4[%c0_4, %c0_5] : memref<1x128xf32, #tpu.memory_space<vmem>>, vector<1x128xf32>
    %7 = vector.broadcast %6 : vector<1x128xf32> to vector<32x128xf32>
    %8 = arith.addf %5, %7 : vector<32x128xf32>
    %cst = arith.constant 0.000000e+00 : f32
    %9 = vector.broadcast %cst : f32 to vector<32x128xf32>
    %10 = arith.maximumf %8, %9 : vector<32x128xf32>
    %c0_6 = arith.constant 0 : index
    %c0_7 = arith.constant 0 : index
    %c0_8 = arith.constant 0 : index
    %11 = vector.load %arg5[%c0_6, %c0_7, %c0_8] : memref<1x32x128xf32, #tpu.memory_space<vmem>>, vector<1x32x128xf32>
    %12 = vector.shape_cast %11 : vector<1x32x128xf32> to vector<32x128xf32>
    %13 = vector.shape_cast %10 : vector<32x128xf32> to vector<1x32x128xf32>
    tpu.vector_store %arg5[%c0_6, %c0_7, %c0_8], %13 {strides = array<i32>} : memref<1x32x128xf32, #tpu.memory_space<vmem>>, vector<1x32x128xf32>,
    return
  }
  func.func @transform_0(%arg0: i32, %arg1: i32) -> (i32, i32, i32) {
    %c0_i32 = arith.constant 0 : i32
    %c0_i32_0 = arith.constant 0 : i32
    return %arg0, %arg1, %c0_i32 : i32, i32, i32
  }
  func.func @transform_1(%arg0: i32, %arg1: i32) -> (i32, i32) {
    %c0_i32 = arith.constant 0 : i32
    %c0_i32_0 = arith.constant 0 : i32
    %c0_i32_1 = arith.constant 0 : i32
    return %c0_i32, %c0_i32_0 : i32, i32
  }
  func.func @transform_2(%arg0: i32, %arg1: i32) -> (i32, i32) {
    %c0_i32 = arith.constant 0 : i32
    %c0_i32_0 = arith.constant 0 : i32
    %c0_i32_1 = arith.constant 0 : i32
    return %c0_i32, %c0_i32_0 : i32, i32
  }
  func.func @transform_3(%arg0: i32, %arg1: i32) -> (i32, i32, i32) {
    %c0_i32 = arith.constant 0 : i32
    %c0_i32_0 = arith.constant 0 : i32
    return %arg0, %arg1, %c0_i32 : i32, i32, i32
  }
}

</mosaic_0001>

<bundles_post_ra>
// kernel: mul.4
= control target key start
LH: loop header
LB: loop body
LE: loop exit
PB: predicated region body
PF: predicated region fallthrough
CT: control target
= control target key end

     0   :  { %vm47_vm0 = vcmask 261120   ;;  %s185_s0 = inlined_call_operand.vmem [shape: f32[3,3,3,32], index: 0, kind: input, shape index: {}]   ;;  %s186_s1 = inlined_call_operand.vmem [shape: f32[27,32], index: 1, kind: output, shape index: {}]  }
   0x1   :  { %v96_v0 = vld [vmem:[%s185_s0 + $0x20] sm:$0xf]  ;;  %v97_v1 = vld [vmem:[%s185_s0 + $0x1c] sm:$0xf]  ;;  %v98_v2 = vld [vmem:[%s185_s0 + $0x18] sm:$0xf] }
   0x2   :  { %9 = vst [vmem:[#allocation0 + $0x10] sm:$0xf] %v96_v0  ;;  %14 = vst [vmem:[#allocation0 + $0x40] sm:$0xf] %v97_v1  ;;  %v99_v3 = vld [vmem:[%s185_s0 + $0x14] sm:$0xf] }
   0x3   :  { %19 = vst [vmem:[#allocation0 + $0x28] sm:$0xf] %v98_v2  ;;  %v100_v4 = vld [vmem:[%s185_s0 + $0x10] sm:$0xf]  ;;  %v101_v5 = vld [vmem:[%s185_s0 + $0xc] sm:$0xf] }
   0x4   :  { %24 = vst [vmem:[#allocation0 + $0x30] sm:$0xf] %v99_v3  ;;  %29 = vst [vmem:[#allocation0 + $0x20] sm:$0xf] %v100_v4  ;;  %v102_v6 = vld [vmem:[%s185_s0 + $0x8] sm:$0xf] }
   0x5   :  { %34 = vst [vmem:[#allocation0 + $0x18] sm:$0xf] %v101_v5  ;;  %v103_v7 = vld [vmem:[%s185_s0 + $0x4] sm:$0xf]  ;;  %v44_v8 = vld [vmem:[%s185_s0] sm:$0xf] }
   0x6   :  { %39 = vst [vmem:[#allocation0] sm:$0xf] %v102_v6  ;;  %43 = vst [vmem:[#allocation0 + $0x8] sm:$0xf] %v103_v7 }
   0x7   :  { %45 = vst [vmem:[#allocation0 + $0x38] sm:$0xf] %v44_v8 }
   0x9   :  { %v80_v10 = vld [vmem:[#allocation0 + $0x40] sm:$0x7]   ;;  %v85_v11 = vld [vmem:[#allocation0 + $0x10] sm:$0x7]  }
   0xa   :  { %v75_v9 = vld [vmem:[#allocation0 + $0x28] sm:$0x7]   ;;  %110 = vst.msk [vmem:[%s186_s1 + $0x15] sm:$0x7] %vm47_vm0, %v80_v10   ;;  %111 = vst.msk [vmem:[%s186_s1 + $0x18] sm:$0x7] %vm47_vm0, %v85_v11  }
   0xb   :  { %v65_v13 = vld [vmem:[#allocation0 + $0x20] sm:$0x7]   ;;  %v70_v14 = vld [vmem:[#allocation0 + $0x30] sm:$0x7]   ;;  %109 = vst.msk [vmem:[%s186_s1 + $0x12] sm:$0x7] %vm47_vm0, %v75_v9  }
   0xc   :  { %v60_v12 = vld [vmem:[#allocation0 + $0x18] sm:$0x7]   ;;  %107 = vst.msk [vmem:[%s186_s1 + $0xc] sm:$0x7] %vm47_vm0, %v65_v13   ;;  %108 = vst.msk [vmem:[%s186_s1 + $0xf] sm:$0x7] %vm47_vm0, %v70_v14  }
   0xd   :  { %v50_v16 = vld [vmem:[#allocation0 + $0x8] sm:$0x7]   ;;  %v55_v17 = vld [vmem:[#allocation0] sm:$0x7]   ;;  %106 = vst.msk [vmem:[%s186_s1 + $0x9] sm:$0x7] %vm47_vm0, %v60_v12  }
   0xe   :  { %v46_v15 = vld [vmem:[#allocation0 + $0x38] sm:$0x7]   ;;  %104 = vst.msk [vmem:[%s186_s1 + $0x3] sm:$0x7] %vm47_vm0, %v50_v16   ;;  %105 = vst.msk [vmem:[%s186_s1 + $0x6] sm:$0x7] %vm47_vm0, %v55_v17  }
   0xf   :  { %48 = vst.msk [vmem:[%s186_s1] sm:$0x7] %vm47_vm0, %v46_v15  }

// kernel: squeeze.2
= control target key start
LH: loop header
LB: loop body
LE: loop exit
PB: predicated region body
PF: predicated region fallthrough
CT: control target
= control target key end

     0   :  { %s40_s8 = smov 32   ;;  %vm8_vm0 = vcmask 261120   ;;  %s41_s9 = smov 64   ;;  %s58_s0 = inlined_call_operand.vmem [shape: f32[128], index: 0, kind: input, shape index: {}]   ;;  %s59_s1 = inlined_call_operand.vmem [shape: f32[4,32], index: 1, kind: output, shape index: {}]  }
   0x1   :  { %v5_v0 = vld [vmem:[%s58_s0] sm:$0x1]  ;;  %s39_s0 = smov 96  }
   0x2   :  { %6 = vst [vmem:[#allocation1] sm:$0x1] %v5_v0 }
   0x9   :  { %v10_v1 = vld [vmem:[#allocation1] sm:$0x1]  }
   0xa   :  { %v22_v2 = vld [vmem:[#allocation1] sm:$0x1]   ;;  %11 = vrot.lane.b32.xlu0 %v10_v1, %s39_s0 }
   0xb   :  { %23 = vrot.lane.b32.xlu1 %v22_v2, %s40_s8  ;;  %v7_v3 = vld [vmem:[#allocation1] sm:$0x1]  }
   0xc   :  { %v16_v4 = vld [vmem:[#allocation1] sm:$0x1]   ;;  %9 = vst.msk [vmem:[#allocation0] sm:$0x1] %vm8_vm0, %v7_v3  }
   0xe   :  { %17 = vrot.lane.b32.xlu0 %v16_v4, %s41_s9 }
  0x7c   :  { %v12_v5 = vpop.permute.xlu0 %11  }
  0x7d   :  { %v24_v6 = vpop.permute.xlu1 %23   ;;  %15 = vst.msk [vmem:[#allocation0 + $0x1] sm:$0x1] %vm8_vm0, %v12_v5  }
  0x7e   :  { %27 = vst.msk [vmem:[#allocation0 + $0x3] sm:$0x1] %vm8_vm0, %v24_v6  }
  0x80   :  { %v18_v7 = vpop.permute.xlu0 %17  }
  0x81   :  { %21 = vst.msk [vmem:[#allocation0 + $0x2] sm:$0x1] %vm8_vm0, %v18_v7  }
  0x88   :  { %v32_v8 = vld [vmem:[#allocation0] sm:$0xf] }
  0x89   :  { %35 = vst [vmem:[%s59_s1] sm:$0xf] %v32_v8 }

// kernel: tile.13
= control target key start
LH: loop header
LB: loop body
LE: loop exit
PB: predicated region body
PF: predicated region fallthrough
CT: control target
= control target key end

     0   :  { %s22_s0 = inlined_call_operand.vmem [shape: f32[32], index: 0, kind: input, shape index: {}]   ;;  %s23_s1 = inlined_call_operand.vmem [shape: f32[4,32], index: 1, kind: output, shape index: {}]  }
   0x1   :  { %v4_v0 = vld [vmem:[%s22_s0] ss:$0 sm:$0xff] }
   0x2   :  { %5 = vst [vmem:[%s23_s1] sm:$0xf] %v4_v0 }

// kernel: tile.14
= control target key start
LH: loop header
LB: loop body
LE: loop exit
PB: predicated region body
PF: predicated region fallthrough
CT: control target
= control target key end

     0   :  { %vm8_vm0 = vcmask 261120   ;;  %s40_s8 = smov 32   ;;  %s41_s9 = smov 64   ;;  %vm14_vm1 = vcmask 1048320   ;;  %vm20_vm2 = vcmask 785920   ;;  %vm26_vm3 = vcmask 523520   ;;  %s58_s0 = inlined_call_operand.vmem [shape: f32[4,32], index: 0, kind: input, shape index: {}]   ;;  %s59_s1 = inlined_call_operand.vmem [shape: f32[1,128], index: 1, kind: output, shape index: {}]  }
   0x1   :  { %v5_v0 = vld [vmem:[%s58_s0] sm:$0xf]  ;;  %s39_s0 = smov 96  }
   0x2   :  { %6 = vst [vmem:[#allocation1] sm:$0xf] %v5_v0 }
   0x9   :  { %v11_v1 = vld [vmem:[#allocation1 + $0x3] sm:$0x1]   ;;  %v23_v2 = vld [vmem:[#allocation1 + $0x1] sm:$0x1]   ;;  %v7_v3 = vld [vmem:[#allocation1] sm:$0x1]  }
   0xa   :  { %12 = vrot.lane.b32.xlu0 %v11_v1, %s39_s0  ;;  %24 = vrot.lane.b32.xlu1 %v23_v2, %s40_s8  ;;  %v17_v4 = vld [vmem:[#allocation1 + $0x2] sm:$0x1]   ;;  %9 = vst.msk [vmem:[#allocation0] sm:$0x1] %vm8_vm0, %v7_v3  }
   0xe   :  { %18 = vrot.lane.b32.xlu0 %v17_v4, %s41_s9 }
  0x7c   :  { %v13_v5 = vpop.permute.xlu0 %12   ;;  %v25_v6 = vpop.permute.xlu1 %24  }
  0x7d   :  { %15 = vst.msk [vmem:[#allocation0] sm:$0x1] %vm14_vm1, %v13_v5  }
  0x80   :  { %v19_v7 = vpop.permute.xlu0 %18  }
  0x81   :  { %21 = vst.msk [vmem:[#allocation0] sm:$0x1] %vm20_vm2, %v19_v7  }
  0x82   :  { %27 = vst.msk [vmem:[#allocation0] sm:$0x1] %vm26_vm3, %v25_v6  }
  0x89   :  { %v32_v8 = vld [vmem:[#allocation0] sm:$0x1] }
  0x8a   :  { %35 = vst [vmem:[%s59_s1] sm:$0x1] %v32_v8 }

// kernel: efficientnet_b0_q_forward.3
= control target key start
LH: loop header
LB: loop body
LE: loop exit
PB: predicated region body
PF: predicated region fallthrough
CT: control target
= control target key end

     0   :  { %s462_s12 = smov 0   ;;  %s464_s13 = smov 0   ;;  %s519_s0 = inlined_call_operand.vmem [shape: bf16[2,64,128], index: 0, kind: input, shape index: {}]   ;;  %s520_s1 = inlined_call_operand.vmem [shape: f32[1,128], index: 1, kind: input, shape index: {}]   ;;  %s521_s2 = inlined_call_operand.vmem [shape: f32[1,128], index: 2, kind: input, shape index: {}]   ;;  %s522_s3 = inlined_call_operand.vmem [shape: f32[2,64,128], index: 3, kind: output, shape index: {}]  }
   0x1   :  { %s466_s14 = smov 0   ;;  %s468_s15 = smov 0  }
   0x2   :  { %s470_s16 = smov 0  }
   0x3 LB: > { %s22_s17 = sadd.s32 1, %s432_s14  ;;  %s25_s18 = sadd.s32 1, %s436_s15  ;;  %s440_s16 = sphi %s470_s16, %s13_s16   ;;  %s436_s15 = sphi %s468_s15, %s526_s15   ;;  %s432_s14 = sphi %s466_s14, %s525_s14   ;;  %s428_s13 = sphi %s464_s13, %s524_s13   ;;  %s424_s12 = sphi %s462_s12, %s523_s12  }
   0x4   : > { %p23_p0 = scmp.ge.s32.totalorder %s22_s17, 2  ;;  %p342_p1 = scmp.ge.s32.totalorder %s440_s16, 1 }
   0x5   : > { %p158_p2 = scmp.lt.s32.totalorder %s440_s16, 5 }
   0x6   : > { %s528_s17 = smov (%p23_p0, %s22_s17), 0  ;;  %s530_s18 = smov (!%p23_p0, %s25_s18), %s436_s15 }
   0x7   : > { %p159_p3 = pnand %p342_p1, %p158_p2  ;;  %p27_p4 = scmp.ge.s32.totalorder %s530_s18, 2 }
   0x8   : > { %s343_s19 = sshll.u32 (!%p159_p3), %s424_s12, 2  ;;  %p191_p5 = scmp.lt.s32.totalorder (!%p159_p3), %s428_s13, 1 }
   0x9   : > { %s532_s18 = smov (%p27_p4, %s530_s18), 0  ;;  %162 = sbr.rel (%p159_p3) target bundleno = 30 (0x1e), region = 32 }
   0xa   : > { %p193_p6 = scmp.lt.s32.totalorder (!%p159_p3), %s343_s19, 7 }
   0xe   : > { %s534_s13 = smov (!%p191_p5, %s428_s13), 1  ;;  %s536_s19 = smov (!%p193_p6, %s343_s19), 7  ;;  %v349_v1 = vld [vmem:[%s520_s1] ss:$0 sm:$0xff] }
   0xf   : > { %s344_s20 = sshll.u32 %s534_s13, 3  ;;  %v350_v7 = vld [vmem:[%s521_s2] ss:$0 sm:$0xff] }
  0x10   : > { %s196_s21 = sadd.s32 %s344_s20, %s536_s19 }
  0x11   : > { %s345_s22 = sshll.u32 %s196_s21, 2  ;;  %s348_s30 = sshll.u32 %s196_s21, 3 }
  0x12   : > { %s198_s25 = scalar_lea.vmem %s519_s0, %s345_s22  ;;  %s208_s6 = scalar_lea.vmem %s522_s3, %s348_s30 }
  0x13   : > { %v354_v0 = vld [vmem:[%s198_s25] sm:$0xff]   ;;  %v361_v2 = vld [vmem:[%s198_s25 + $0x8] sm:$0xff]  }
  0x14   : > { %v355_v3 = vunpack.c.l.bf16 %v354_v0  ;;  %v356_v4 = vunpack.c.h.bf16 %v354_v0  ;;  %v359_v5 = vunpack.c.l.bf16 %v361_v2  ;;  %v360_v6 = vunpack.c.h.bf16 %v361_v2 }
  0x16   : > { %v225_v8 = vmul.f32 %v355_v3, %v349_v1  ;;  %v226_v9 = vmul.f32 %v356_v4, %v349_v1  ;;  %v227_v10 = vmul.f32 %v359_v5, %v349_v1  ;;  %v228_v11 = vmul.f32 %v360_v6, %v349_v1 }
  0x18   : > { %v236_v12 = vadd.f32 %v350_v7, %v225_v8  ;;  %v237_v13 = vadd.f32 %v350_v7, %v226_v9  ;;  %v238_v14 = vadd.f32 %v350_v7, %v227_v10  ;;  %v239_v15 = vadd.f32 %v350_v7, %v228_v11 }
  0x1a   : > { %v240_v16 = vmax.f32 %v236_v12, 0.0  ;;  %v241_v17 = vmax.f32 %v237_v13, 0.0  ;;  %v242_v18 = vmax.f32 %v238_v14, 0.0  ;;  %v243_v19 = vmax.f32 %v239_v15, 0.0 }
  0x1c   : > { %244 = vst [vmem:[%s208_s6] sm:$0xff] %v240_v16  ;;  %245 = vst [vmem:[%s208_s6 + $0x8] sm:$0xff] %v241_v17 }
  0x1d   : > { %246 = vst [vmem:[%s208_s6 + $0x10] sm:$0xff] %v242_v18  ;;  %247 = vst [vmem:[%s208_s6 + $0x18] sm:$0xff] %v243_v19 }
  0x1e PF: > { %s13_s16 = sadd.s32 1, %s440_s16   ;;  %s523_s12 = smov %s432_s14 }
  0x1f   : > { %p10_p7 = scmp.ge.s32.totalorder %s13_s16, 6   ;;  %s524_s13 = smov %s436_s15 }
  0x20   : > { %s525_s14 = smov %s528_s17  ;;  %s526_s15 = smov %s532_s18 }
  0x21   :  { %12 = sbr.rel (!%p10_p7) target bundleno = 3 (0x3), region = 62 }

// kernel: efficientnet_b0_q_forward.2
= control target key start
LH: loop header
LB: loop body
LE: loop exit
PB: predicated region body
PF: predicated region fallthrough
CT: control target
= control target key end

     0   :  { %s709_s12 = smov 0   ;;  %s711_s13 = smov 0   ;;  %s801_s0 = inlined_call_operand.vmem [shape: bf16[2,64,108], index: 0, kind: input, shape index: {}]   ;;  %s802_s1 = inlined_call_operand.vmem [shape: bf16[108,128], index: 1, kind: input, shape index: {}]   ;;  %s803_s2 = inlined_call_operand.vmem [shape: bf16[2,64,128], index: 2, kind: output, shape index: {0}]   ;;  %s804_s3 = inlined_call_operand.vmem [shape: f32[2,2,128], index: 3, kind: output, shape index: {1}]  }
   0x1   :  { %s713_s14 = smov 0   ;;  %s715_s15 = smov 0  }
   0x2   :  { %s717_s16 = smov 0  }
   0x3 LB: > { %s23_s17 = sadd.s32 1, %s678_s14  ;;  %s26_s18 = sadd.s32 1, %s682_s15  ;;  %s686_s16 = sphi %s717_s16, %s14_s16   ;;  %s682_s15 = sphi %s715_s15, %s808_s15   ;;  %s678_s14 = sphi %s713_s14, %s807_s14   ;;  %s674_s13 = sphi %s711_s13, %s806_s13   ;;  %s670_s12 = sphi %s709_s12, %s805_s12  }
   0x4   : > { %p24_p0 = scmp.ge.s32.totalorder %s23_s17, 2  ;;  %p529_p1 = scmp.ge.s32.totalorder %s686_s16, 1 }
   0x5   : > { %p161_p2 = scmp.lt.s32.totalorder %s686_s16, 5 }
   0x6   : > { %s810_s17 = smov (%p24_p0, %s23_s17), 0  ;;  %s812_s18 = smov (!%p24_p0, %s26_s18), %s682_s15 }
   0x7   : > { %p162_p3 = pnand %p529_p1, %p161_p2  ;;  %p28_p4 = scmp.ge.s32.totalorder %s812_s18, 2 }
   0x8   : > { %s530_s19 = sshll.u32 (!%p162_p3), %s670_s12, 2  ;;  %p198_p5 = scmp.lt.s32.totalorder (!%p162_p3), %s674_s13, 1 }
   0x9   : > { %s814_s18 = smov (%p28_p4, %s812_s18), 0  ;;  %165 = sbr.rel (%p162_p3) target bundleno = 275 (0x113), region = 28 }
   0xa   : > { %p200_p6 = scmp.lt.s32.totalorder (!%p162_p3), %s530_s19, 7  ;;  %p537_p7 = scmp.ne.s32.totalorder (!%p162_p3), %s670_s12, 0 }
   0xe   : > { %s816_s13 = smov (!%p198_p5, %s674_s13), 1  ;;  %s818_s19 = smov (!%p200_p6, %s530_s19), 7 }
   0xf   : > { %s531_s20 = sshll.u32 %s816_s13, 3  ;;  %s536_s21 = sshll.u32 %s816_s13, 1 }
  0x10   : > { %s203_s22 = sadd.s32 %s531_s20, %s818_s19  ;;  %s742_s25 = scalar_lea.vmem %s804_s3, %s536_s21 }
  0x11   : > { %s532_s26 = sshll.u32 %s203_s22, 2  ;;  %225 = sbr.rel (%p537_p7) target bundleno = 24 (0x18), region = 32 }
  0x12   : > { %s747_s29 = scalar_lea.vmem %s801_s0, %s532_s26  ;;  %s752_s5 = scalar_lea.vmem %s803_s2, %s532_s26 }
  0x16   : > { %v688_v0 = vmov 0.0  }
  0x17   : > { %226 = vst [vmem:[%s742_s25] sm:$0x3] %v688_v0 }
  0x18 PF: > { %v639_v1 = vld [vmem:[%s802_s1 + $0x30] sm:$0x3f]   ;;  %vm303_vm0 = vcmask 1045504   ;;  %v640_v2 = vld [vmem:[%s802_s1 + $0x28] sm:$0xff]   ;;  %v641_v4 = vld [vmem:[%s802_s1 + $0x20] sm:$0xff]   ;;  %vm296_vm1 = vcmask 883712  }
  0x19   : > { %597 = vmatprep.subr.msk.bf16.mxu0 %vm303_vm0, %v639_v1  ;;  %v305_v3 = vsel %vm303_vm0, %v639_v1, 0  ;;  %v646_v5 = vld [vmem:[%s747_s29] sm:$0xff]   ;;  %v642_v6 = vld [vmem:[%s802_s1 + $0x18] sm:$0xff]   ;;  %v643_v7 = vld [vmem:[%s802_s1 + $0x10] sm:$0xff]  }
  0x1a   : > { %580 = vmatpush3.bf16.msra.mxu0 %v305_v3  ;;  %593 = vmatprep.mubr.msk.bf16.mxu0 %vm296_vm1, %v646_v5  ;;  %v644_v8 = vld [vmem:[%s802_s1 + $0x8] sm:$0xff]   ;;  %v645_v9 = vld [vmem:[%s802_s1] sm:$0xff]  }
  0x1b   : > { %581 = vmatprep.subr.bf16.mxu0 %v640_v2  ;;  %v647_v10 = vld [vmem:[%s747_s29 + $0x8] sm:$0xff]  }
  0x1e   : > { %582 = vmatpush3.bf16.msra.mxu0 %v640_v2  ;;  %v376_v36 = vld [vmem:[%s742_s25] sm:$0x1]  ;;  %v388_v39 = vld [vmem:[%s742_s25 + $0x1] sm:$0x1] }
  0x1f   : > { %583 = vmatprep.subr.bf16.mxu0 %v641_v4 }
  0x22   : > { %584 = vmatpush3.bf16.msra.mxu0 %v641_v4 }
  0x23   : > { %585 = vmatprep.subr.bf16.mxu0 %v642_v6 }
  0x26   : > { %586 = vmatpush3.bf16.msra.mxu0 %v642_v6 }
  0x27   : > { %587 = vmatprep.subr.bf16.mxu0 %v643_v7 }
  0x2a   : > { %588 = vmatpush3.bf16.msra.mxu0 %v643_v7 }
  0x2b   : > { %589 = vmatprep.subr.bf16.mxu0 %v644_v8 }
  0x2e   : > { %590 = vmatpush3.bf16.msra.mxu0 %v644_v8 }
  0x2f   : > { %591 = vmatprep.subr.bf16.mxu0 %v645_v9 }
  0x32   : > { %592 = vmatpush3.bf16.msra.mxu0 %v645_v9 }
  0x35   : > { %594 = vmatmul.mubr.msk.bf16.vlgmr.msra.gmra.mxu0 %vm296_vm1, %v647_v10 }
  0xf5   : > { %v595_v11 = vpop.f32.mrf.mxu0 }
  0xf6   : > { %v391_v20 = vmul.f32 %v595_v11, %v595_v11 }
  0xf7   : > { %v341_v12 = vpop.f32.mrf.mxu0 }
  0xf8   : > { %v389_v16 = vmul.f32 %v341_v12, %v341_v12 }
  0xf9   : > { %v596_v13 = vpop.f32.mrf.mxu0 }
  0xfa   : > { %v567_v14 = vpack.c.bf16 %v596_v13, %v595_v11  ;;  %v392_v23 = vmul.f32 %v596_v13, %v596_v13 }
  0xfb   : > { %v344_v15 = vpop.f32.mrf.mxu0 }
  0xfc   : > { %569 = vst [vmem:[%s752_s5 + $0x8] sm:$0xff] %v567_v14   ;;  %v562_v17 = vpack.c.bf16 %v344_v15, %v341_v12  ;;  %v377_v18 = vadd.f32 %v344_v15, %v341_v12  ;;  %v390_v19 = vmul.f32 %v344_v15, %v344_v15 }
  0xfe   : > { %563 = vst [vmem:[%s752_s5] sm:$0xff] %v562_v17   ;;  %v378_v21 = vadd.f32 %v595_v11, %v377_v18  ;;  %v393_v22 = vadd.f32 %v390_v19, %v389_v16 }
 0x100   : > { %v379_v24 = vadd.f32 %v596_v13, %v378_v21  ;;  %v394_v25 = vadd.f32 %v393_v22, %v391_v20 }
 0x102   : > { %v380_v26 = vrot.slane %v379_v24, 4  ;;  %v395_v27 = vadd.f32 %v394_v25, %v392_v23 }
 0x104   : > { %v381_v28 = vadd.f32 %v380_v26, %v379_v24  ;;  %v396_v29 = vrot.slane %v395_v27, 4 }
 0x106   : > { %v382_v30 = vrot.slane %v381_v28, 2  ;;  %v397_v31 = vadd.f32 %v396_v29, %v395_v27 }
 0x108   : > { %v383_v32 = vadd.f32 %v382_v30, %v381_v28  ;;  %v398_v33 = vrot.slane %v397_v31, 2 }
 0x10a   : > { %v384_v34 = vrot.slane %v383_v32, 1  ;;  %v399_v35 = vadd.f32 %v398_v33, %v397_v31 }
 0x10c   : > { %v385_v37 = vadd.f32 %v384_v34, %v383_v32  ;;  %v400_v38 = vrot.slane %v399_v35, 1 }
 0x10e   : > { %v386_v40 = vadd.f32 %v385_v37, %v376_v36  ;;  %v401_v41 = vadd.f32 %v400_v38, %v399_v35 }
 0x110   : > { %387 = vst [vmem:[%s742_s25] sm:$0x1] %v386_v40  ;;  %v402_v42 = vadd.f32 %v401_v41, %v388_v39 }
 0x112   : > { %403 = vst [vmem:[%s742_s25 + $0x1] sm:$0x1] %v402_v42 }
 0x113 PF: > { %s14_s16 = sadd.s32 1, %s686_s16   ;;  %s805_s12 = smov %s678_s14 }
 0x114   : > { %p11_p8 = scmp.ge.s32.totalorder %s14_s16, 6   ;;  %s806_s13 = smov %s682_s15 }
 0x115   : > { %s807_s14 = smov %s810_s17  ;;  %s808_s15 = smov %s814_s18 }
 0x116   :  { %13 = sbr.rel (!%p11_p8) target bundleno = 3 (0x3), region = 74 }

</bundles_post_ra>
